<compile_context>
chip_gen: v6e
topology: v6e:2x2x1
jax: 0.10.0
libtpu: 0.0.40
codegen_flags: <defaults>
</compile_context>

<pallas_src>
import functools

import jax
import jax.numpy as jnp
from jax.experimental import pallas as pl
from jax.experimental.pallas import tpu as pltpu

_LANE = 128
_SUBLANE = 8


def _round_up(n, m):
    return ((n + m - 1) // m) * m


def _device_kind():
    try:
        return jax.devices()[0].device_kind.lower()
    except Exception:
        return ""


def _default_block_b():
    k = _device_kind()
    if "v7" in k:
        return 4096
    if "v6" in k:
        return 2048
    return 1024


def _activation_dtype_name():
    # bf16 elementwise on v6e/v7x (bf16 VPU/EUP); keep f32 on v5e and older.
    k = _device_kind()
    return "bfloat16" if ("v6" in k or "v7" in k) else "float32"


# ----------------------------------------------------------------------------- kernel


def _make_kernel(act_dtype):
    def kernel(x_ref, w1_ref, b1_ref, w2_ref, b2_ref, w3_ref, b3_ref, o_ref):
        x = x_ref[...]  # bf16 (bb, in_p)

        # ---- map1 + ELU (alpha = 1.0), kept in f32 for precision near zero ----
        h1 = jnp.dot(x, w1_ref[...], preferred_element_type=jnp.float32) + b1_ref[...]
        neg = jnp.minimum(h1, 0.0)            # unselected branch can never overflow
        elu_neg = jnp.exp(neg) - 1.0
        h1 = jnp.where(h1 > 0, h1, elu_neg)

        # ---- map2 + sigmoid (bf16 elementwise on v6e/v7x, f32 on v5e) ----
        h2 = jnp.dot(h1.astype(jnp.bfloat16), w2_ref[...],
                     preferred_element_type=jnp.float32) + b2_ref[...]
        h2 = h2.astype(act_dtype)
        h2 = 1.0 / (1.0 + jnp.exp(-h2))

        # ---- map3 (no activation); unpadded f32 store ----
        o_ref[...] = jnp.dot(h2.astype(jnp.bfloat16), w3_ref[...],
                             preferred_element_type=jnp.float32) + b3_ref[...]

    return kernel


def _build_call(B_p, bb, in_p, hid_p, out_size, act_dtype):
    grid = (B_p // bb,)

    # Grid-invariant weights/biases: constant index_map, full-array blocks.
    resident = lambda shape: pl.BlockSpec(shape, lambda i: (0, 0))

    flops = 2 * B_p * (in_p * hid_p + hid_p * hid_p + hid_p * out_size)
    transcendentals = 2 * B_p * hid_p  # one exp per hidden lane in ELU + sigmoid
    bytes_accessed = (
        B_p * in_p * 2                                   # x (bf16)
        + B_p * out_size * 4                             # out (f32)
        + (in_p * hid_p + hid_p * hid_p + hid_p * out_size) * 2  # weights (bf16)
        + (2 * hid_p + out_size) * 4                     # biases (f32)
    )

    return pl.pallas_call(
        _make_kernel(act_dtype),
        out_shape=jax.ShapeDtypeStruct((B_p, out_size), jnp.float32),
        grid_spec=pltpu.PrefetchScalarGridSpec(
            num_scalar_prefetch=0,
            grid=grid,
            in_specs=[
                pl.BlockSpec((bb, in_p), lambda i: (i, 0)),  # x tile (batch-tiled)
                resident((in_p, hid_p)),    # w1
                resident((1, hid_p)),       # b1
                resident((hid_p, hid_p)),   # w2
                resident((1, hid_p)),       # b2
                resident((hid_p, out_size)),  # w3 (real last dim, no lane pad)
                resident((1, out_size)),      # b3
            ],
            out_specs=pl.BlockSpec((bb, out_size), lambda i: (i, 0)),
        ),
        compiler_params=pltpu.CompilerParams(
            dimension_semantics=("parallel",),      # batch tiles shard across TCs (v7x)
            vmem_limit_bytes=32 * 1024 * 1024,      # few MiB used even at bb=4096
        ),
        cost_estimate=pl.CostEstimate(
            flops=flops,
            transcendentals=transcendentals,
            bytes_accessed=bytes_accessed,
        ),
    )


# ----------------------------------------------------------------------------- wrapper


def prepare_params(params, *, lane=_LANE):
    """One-time weight prep (pad + bf16 cast), hoisted out of the forward pass.

    params: dict with w1 (in,hid), b1 (1,hid), w2 (hid,hid), b2 (1,hid),
            w3 (hid,out), b3 (1,out), all f32, weights stored (in, out).
    Returns a tuple of device arrays consumed by generator_forward.
    """
    in_size, hidden = params["w1"].shape
    out_size = params["w3"].shape[1]

    in_p = _round_up(in_size, _SUBLANE)   # minimal sublane pad; keeps the x stream small
    hid_p = _round_up(hidden, lane)       # MXU-friendly hidden (VMEM-only, exact: pads hit zero w3 rows)

    w1 = jnp.pad(params["w1"], ((0, in_p - in_size), (0, hid_p - hidden))).astype(jnp.bfloat16)
    b1 = jnp.pad(params["b1"], ((0, 0), (0, hid_p - hidden))).astype(jnp.float32)
    w2 = jnp.pad(params["w2"], ((0, hid_p - hidden), (0, hid_p - hidden))).astype(jnp.bfloat16)
    b2 = jnp.pad(params["b2"], ((0, 0), (0, hid_p - hidden))).astype(jnp.float32)
    w3 = jnp.pad(params["w3"], ((0, hid_p - hidden), (0, 0))).astype(jnp.bfloat16)
    b3 = params["b3"].astype(jnp.float32)
    return (w1, b1, w2, b2, w3, b3)


@functools.partial(jax.jit, static_argnames=("block_b", "act_dtype"))
def _forward(x, w1, b1, w2, b2, w3, b3, *, block_b, act_dtype):
    B, in_size = x.shape
    in_p, hid_p = w1.shape
    out_size = w3.shape[1]
    act = jnp.bfloat16 if act_dtype == "bfloat16" else jnp.float32

    # Batch tiling: big tiles; keep >= 2 grid steps when possible so the
    # "parallel" axis actually uses both TensorCores on v7x.
    B8 = _round_up(B, _SUBLANE)
    bb = min(block_b, B8)
    if B8 > _SUBLANE and B8 // bb < 2:
        bb = _round_up((B8 + 1) // 2, _SUBLANE)
    B_p = _round_up(B8, bb)

    # Pad (batch to tile multiple, features to sublane multiple) + bf16 cast;
    # fused into this jitted graph, so no extra eager HBM round trip.
    xp = jnp.pad(x, ((0, B_p - B), (0, in_p - in_size))).astype(jnp.bfloat16)

    out = _build_call(B_p, bb, in_p, hid_p, out_size, act)(xp, w1, b1, w2, b2, w3, b3)
    return out[:B, :]


def generator_forward(x, prepared, *, block_b=None):
    """x: (B, input_size) float32.  prepared: output of prepare_params()."""
    if block_b is None:
        block_b = _default_block_b()
    return _forward(x, *prepared, block_b=block_b, act_dtype=_activation_dtype_name())


# ----------------------------------------------------------------------------- reference / test


def init_params(key, input_size, hidden_size, output_size):
    """Deterministic synthetic init (PyTorch-Linear-like uniform ranges)."""
    ks = jax.random.split(key, 6)

    def lin(kw, kb, fan_in, fan_out):
        bound = 1.0 / jnp.sqrt(fan_in)
        # stored as (in, out) == transposed PyTorch weight
        w = jax.random.uniform(kw, (fan_in, fan_out), jnp.float32, -bound, bound)
        b = jax.random.uniform(kb, (1, fan_out), jnp.float32, -bound, bound)
        return w, b

    w1, b1 = lin(ks[0], ks[1], input_size, hidden_size)
    w2, b2 = lin(ks[2], ks[3], hidden_size, hidden_size)
    w3, b3 = lin(ks[4], ks[5], hidden_size, output_size)
    return {"w1": w1, "b1": b1, "w2": w2, "b2": b2, "w3": w3, "b3": b3}


def reference_forward(x, p):
    """Reference emulating the kernel's bf16 matmul operands / f32 accumulation."""
    q = lambda a: a.astype(jnp.bfloat16).astype(jnp.float32)
    h1 = jax.nn.elu(q(x) @ q(p["w1"]) + p["b1"])
    h2 = jax.nn.sigmoid(q(h1) @ q(p["w2"]) + p["b2"])
    return q(h2) @ q(p["w3"]) + p["b3"]


if __name__ == "__main__":
    key = jax.random.PRNGKey(0)
    k_x, k_p = jax.random.split(key)

    batch, input_size, hidden_size, output_size = 16, 8, 32, 8

    x = jax.random.normal(k_x, (batch, input_size), jnp.float32)
    params = init_params(k_p, input_size, hidden_size, output_size)

    prepared = prepare_params(params)          # one-time weight prep (hoisted)
    out = generator_forward(x, prepared)
    out = jax.block_until_ready(out)

    ref = reference_forward(x, params)
    assert out.shape == (batch, output_size)
    # Tolerance covers bf16 matmul operands and the bf16 sigmoid chain on v6e/v7x.
    assert jnp.allclose(out, ref, atol=2e-2, rtol=2e-2), "mismatch vs reference"

    print("KERNEL_OK")
</pallas_src>

<mosaic_0001>
module attributes {stable_mosaic.version = 11 : i64} {
  func.func @kernel(%arg0: i32, %arg1: memref<8x8xbf16, #tpu.memory_space<vmem>>, %arg2: memref<8x128xbf16, #tpu.memory_space<vmem>>, %arg3: memref<1x128xf32, #tpu.memory_space<vmem>>, %arg4: memref<128x128xbf16, #tpu.memory_space<vmem>>, %arg5: memref<1x128xf32, #tpu.memory_space<vmem>>, %arg6: memref<128x8xbf16, #tpu.memory_space<vmem>>, %arg7: memref<1x8xf32, #tpu.memory_space<vmem>>, %arg8: memref<8x8xf32, #tpu.memory_space<vmem>>) attributes {dimension_semantics = [#tpu.dimension_semantics<parallel>], iteration_bounds = array<i64: 2>, scalar_prefetch = 0 : i64, scratch_operands = 0 : i64, tpu.core_type = #tpu.core_type<tc>, window_params = [{transform_indices = @transform_0, window_bounds = array<i64: 8, 8>}, {pipeline_mode = #tpu.pipeline_mode<synchronous>, transform_indices = @transform_1, window_bounds = array<i64: 8, 128>}, {pipeline_mode = #tpu.pipeline_mode<synchronous>, transform_indices = @transform_2, window_bounds = array<i64: 1, 128>}, {pipeline_mode = #tpu.pipeline_mode<synchronous>, transform_indices = @transform_3, window_bounds = array<i64: 128, 128>}, {pipeline_mode = #tpu.pipeline_mode<synchronous>, transform_indices = @transform_4, window_bounds = array<i64: 1, 128>}, {pipeline_mode = #tpu.pipeline_mode<synchronous>, transform_indices = @transform_5, window_bounds = array<i64: 128, 8>}, {pipeline_mode = #tpu.pipeline_mode<synchronous>, transform_indices = @transform_6, window_bounds = array<i64: 1, 8>}, {transform_indices = @transform_7, window_bounds = array<i64: 8, 8>}]} {
    %c0 = arith.constant 0 : index
    %c0_0 = arith.constant 0 : index
    %0 = vector.load %arg1[%c0, %c0_0] : memref<8x8xbf16, #tpu.memory_space<vmem>>, vector<8x8xbf16>
    %c0_1 = arith.constant 0 : index
    %c0_2 = arith.constant 0 : index
    %1 = vector.load %arg2[%c0_1, %c0_2] : memref<8x128xbf16, #tpu.memory_space<vmem>>, vector<8x128xbf16>
    %cst = arith.constant dense<0.000000e+00> : vector<8x128xf32>
    %2 = tpu.matmul %0, %1, %cst {dimension_numbers = #tpu.dot_dimension_numbers<[1], [0], [0], [1], [0, 0, 1, 1], [], []>} : vector<8x8xbf16>, vector<8x128xbf16>, vector<8x128xf32> -> vector<8x128xf32>
    %c0_3 = arith.constant 0 : index
    %c0_4 = arith.constant 0 : index
    %3 = vector.load %arg3[%c0_3, %c0_4] : memref<1x128xf32, #tpu.memory_space<vmem>>, vector<1x128xf32>
    %4 = vector.broadcast %3 : vector<1x128xf32> to vector<8x128xf32>
    %5 = arith.addf %2, %4 : vector<8x128xf32>
    %cst_5 = arith.constant 0.000000e+00 : f32
    %6 = vector.broadcast %cst_5 : f32 to vector<8x128xf32>
    %7 = arith.minimumf %5, %6 : vector<8x128xf32>
    %8 = math.exp %7 : vector<8x128xf32>
    %cst_6 = arith.constant 1.000000e+00 : f32
    %9 = vector.broadcast %cst_6 : f32 to vector<8x128xf32>
    %10 = arith.subf %8, %9 : vector<8x128xf32>
    %cst_7 = arith.constant 0.000000e+00 : f32
    %11 = vector.broadcast %cst_7 : f32 to vector<8x128xf32>
    %12 = arith.cmpf ogt, %5, %11 : vector<8x128xf32>
    %13 = arith.select %12, %5, %10 : vector<8x128xi1>, vector<8x128xf32>
    %14 = arith.truncf %13 : vector<8x128xf32> to vector<8x128xbf16>
    %c0_8 = arith.constant 0 : index
    %c0_9 = arith.constant 0 : index
    %15 = vector.load %arg4[%c0_8, %c0_9] : memref<128x128xbf16, #tpu.memory_space<vmem>>, vector<128x128xbf16>
    %cst_10 = arith.constant dense<0.000000e+00> : vector<8x128xf32>
    %16 = tpu.matmul %14, %15, %cst_10 {dimension_numbers = #tpu.dot_dimension_numbers<[1], [0], [0], [1], [0, 0, 1, 1], [], []>} : vector<8x128xbf16>, vector<128x128xbf16>, vector<8x128xf32> -> vector<8x128xf32>
    %c0_11 = arith.constant 0 : index
    %c0_12 = arith.constant 0 : index
    %17 = vector.load %arg5[%c0_11, %c0_12] : memref<1x128xf32, #tpu.memory_space<vmem>>, vector<1x128xf32>
    %18 = vector.broadcast %17 : vector<1x128xf32> to vector<8x128xf32>
    %19 = arith.addf %16, %18 : vector<8x128xf32>
    %cst_13 = arith.constant 0.000000e+00 : f32
    %20 = vector.broadcast %cst_13 : f32 to vector<8x128xf32>
    %21 = arith.subf %20, %19 : vector<8x128xf32>
    %22 = math.exp %21 : vector<8x128xf32>
    %cst_14 = arith.constant 1.000000e+00 : f32
    %23 = vector.broadcast %cst_14 : f32 to vector<8x128xf32>
    %24 = arith.addf %23, %22 : vector<8x128xf32>
    %cst_15 = arith.constant 1.000000e+00 : f32
    %25 = vector.broadcast %cst_15 : f32 to vector<8x128xf32>
    %26 = arith.divf %25, %24 : vector<8x128xf32>
    %27 = arith.truncf %26 : vector<8x128xf32> to vector<8x128xbf16>
    %c0_16 = arith.constant 0 : index
    %c0_17 = arith.constant 0 : index
    %28 = vector.load %arg6[%c0_16, %c0_17] : memref<128x8xbf16, #tpu.memory_space<vmem>>, vector<128x8xbf16>
    %cst_18 = arith.constant dense<0.000000e+00> : vector<8x8xf32>
    %29 = tpu.matmul %27, %28, %cst_18 {dimension_numbers = #tpu.dot_dimension_numbers<[1], [0], [0], [1], [0, 0, 1, 1], [], []>} : vector<8x128xbf16>, vector<128x8xbf16>, vector<8x8xf32> -> vector<8x8xf32>
    %c0_19 = arith.constant 0 : index
    %c0_20 = arith.constant 0 : index
    %30 = vector.load %arg7[%c0_19, %c0_20] : memref<1x8xf32, #tpu.memory_space<vmem>>, vector<1x8xf32>
    %31 = vector.broadcast %30 : vector<1x8xf32> to vector<8x8xf32>
    %32 = arith.addf %29, %31 : vector<8x8xf32>
    %c0_21 = arith.constant 0 : index
    %c0_22 = arith.constant 0 : index
    %33 = vector.load %arg8[%c0_21, %c0_22] : memref<8x8xf32, #tpu.memory_space<vmem>>, vector<8x8xf32>
    tpu.vector_store %arg8[%c0_21, %c0_22], %32 {strides = array<i32>} : memref<8x8xf32, #tpu.memory_space<vmem>>, vector<8x8xf32>,
    return
  }
  func.func @transform_0(%arg0: i32) -> (i32, i32) {
    %c0_i32 = arith.constant 0 : i32
    %c0_i32_0 = arith.constant 0 : i32
    return %arg0, %c0_i32 : i32, i32
  }
  func.func @transform_1(%arg0: i32) -> (i32, i32) {
    %c0_i32 = arith.constant 0 : i32
    %c0_i32_0 = arith.constant 0 : i32
    %c0_i32_1 = arith.constant 0 : i32
    return %c0_i32, %c0_i32_0 : i32, i32
  }
  func.func @transform_2(%arg0: i32) -> (i32, i32) {
    %c0_i32 = arith.constant 0 : i32
    %c0_i32_0 = arith.constant 0 : i32
    %c0_i32_1 = arith.constant 0 : i32
    return %c0_i32, %c0_i32_0 : i32, i32
  }
  func.func @transform_3(%arg0: i32) -> (i32, i32) {
    %c0_i32 = arith.constant 0 : i32
    %c0_i32_0 = arith.constant 0 : i32
    %c0_i32_1 = arith.constant 0 : i32
    return %c0_i32, %c0_i32_0 : i32, i32
  }
  func.func @transform_4(%arg0: i32) -> (i32, i32) {
    %c0_i32 = arith.constant 0 : i32
    %c0_i32_0 = arith.constant 0 : i32
    %c0_i32_1 = arith.constant 0 : i32
    return %c0_i32, %c0_i32_0 : i32, i32
  }
  func.func @transform_5(%arg0: i32) -> (i32, i32) {
    %c0_i32 = arith.constant 0 : i32
    %c0_i32_0 = arith.constant 0 : i32
    %c0_i32_1 = arith.constant 0 : i32
    return %c0_i32, %c0_i32_0 : i32, i32
  }
  func.func @transform_6(%arg0: i32) -> (i32, i32) {
    %c0_i32 = arith.constant 0 : i32
    %c0_i32_0 = arith.constant 0 : i32
    %c0_i32_1 = arith.constant 0 : i32
    return %c0_i32, %c0_i32_0 : i32, i32
  }
  func.func @transform_7(%arg0: i32) -> (i32, i32) {
    %c0_i32 = arith.constant 0 : i32
    %c0_i32_0 = arith.constant 0 : i32
    return %arg0, %c0_i32 : i32, i32
  }
}

</mosaic_0001>

<bundles_post_ra>
// kernel: _forward.1
= control target key start
LH: loop header
LB: loop body
LE: loop exit
PB: predicated region body
PF: predicated region fallthrough
CT: control target
= control target key end

     0   :  { %s800_s24 = smov 0   ;;  %s906_s0 = inlined_call_operand.vmem [shape: bf16[16,8], index: 0, kind: input, shape index: {}]   ;;  %s907_s1 = inlined_call_operand.vmem [shape: bf16[8,128], index: 1, kind: input, shape index: {}]   ;;  %s908_s2 = inlined_call_operand.vmem [shape: f32[1,128], index: 2, kind: input, shape index: {}]   ;;  %s909_s3 = inlined_call_operand.vmem [shape: bf16[128,128], index: 3, kind: input, shape index: {}]   ;;  %s910_s4 = inlined_call_operand.vmem [shape: f32[1,128], index: 4, kind: input, shape index: {}]   ;;  %s911_s5 = inlined_call_operand.vmem [shape: bf16[128,8], index: 5, kind: input, shape index: {}]   ;;  %s912_s6 = inlined_call_operand.vmem [shape: f32[1,8], index: 6, kind: input, shape index: {}]   ;;  %s913_s7 = inlined_call_operand.vmem [shape: f32[16,8], index: 7, kind: output, shape index: {}]  }
   0x1 LB: > { %s622_s25 = sadd.s32 4294967295, %s756_s24   ;;  %p626_p0 = scmp.ge.s32.totalorder %s756_s24, 1  ;;  %s756_s24 = sphi %s800_s24, %s17_s24  }
   0x2   : > { %p236_p1 = scmp.lt.s32.totalorder %s756_s24, 3 }
   0x4   : > { %p237_p2 = pnand %p626_p0, %p236_p1 }
   0x5   : > { %p266_p3 = scmp.lt.s32.totalorder (!%p237_p2), %s622_s25, 1 }
   0x6   : > { %240 = sbr.rel (%p237_p2) target bundleno = 664 (0x298), region = 48 }
   0xb   : > { %v276_v0 = vld [vmem:[%s907_s1] sm:$0xf]  ;;  %vm288_vm0 = vcmask 1043456   ;;  %v758_v1 = vmov 0.0   ;;  %vm759_vm1 = vmmov 0   ;;  %s915_s25 = smov (!%p266_p3, %s622_s25), 1 }
   0xc   : > { %672 = vmatprep.subr.bf16.mxu0 %v758_v1  ;;  %v290_v2 = vsel %vm288_vm0, %v276_v0, 0  ;;  %674 = vmatprep.mubr.msk.bf16.mxu0 %vm759_vm1, %v758_v1  ;;  %v728_v3 = vld [vmem:[%s909_s3 + $0x38] sm:$0xff]   ;;  %vm284_vm2 = vcmask 64512   ;;  %s627_s30 = sshll.u32 %s915_s25, 2  ;;  %v729_v4 = vld [vmem:[%s909_s3 + $0x30] sm:$0xff]   ;;  %v730_v6 = vld [vmem:[%s909_s3 + $0x28] sm:$0xff]  }
   0xd   : > { %673 = vmatpush3.bf16.msra.mxu0 %v290_v2  ;;  %678 = vmatprep.subr.bf16.mxu1 %v758_v1  ;;  %s269_s12 = scalar_lea.vmem %s906_s0, %s627_s30  ;;  %v731_v7 = vld [vmem:[%s909_s3 + $0x20] sm:$0xff]   ;;  %v732_v8 = vld [vmem:[%s909_s3 + $0x18] sm:$0xff]   ;;  %v733_v9 = vld [vmem:[%s909_s3 + $0x10] sm:$0xff]   ;;  %s628_s26 = sshll.u32 %s915_s25, 3 }
   0xe   : > { %694 = vmatprep.mubr.msk.bf16.mxu1 %vm759_vm1, %v758_v1  ;;  %698 = vmatprep.subr.bf16.mxu0 %v758_v1  ;;  %v275_v5 = vld [vmem:[%s269_s12] sm:$0xf]  ;;  %v734_v10 = vld [vmem:[%s909_s3 + $0x8] sm:$0xff]   ;;  %v736_v24 = vld [vmem:[%s911_s5 + $0x38] sm:$0xff]   ;;  %s273_s8 = scalar_lea.vmem %s913_s7, %s628_s26 }
   0xf   : > { %679 = vmatpush3.bf16.msra.mxu1 %v728_v3  ;;  %v735_v11 = vld [vmem:[%s909_s3] sm:$0xff]   ;;  %v737_v25 = vld [vmem:[%s911_s5 + $0x30] sm:$0xff]   ;;  %v738_v26 = vld [vmem:[%s911_s5 + $0x28] sm:$0xff]  }
  0x10   : > { %680 = vmatprep.subr.bf16.mxu1 %v758_v1  ;;  %675 = vmatmul.mubr.msk.bf16.vlgmr.msra.gmra.mxu0 %vm284_vm2, %v275_v5  ;;  %v629_v12 = vld [vmem:[%s908_s2] ss:$0 sm:$0xff]  ;;  %v740_v28 = vld [vmem:[%s911_s5 + $0x18] sm:$0xff]   ;;  %v741_v29 = vld [vmem:[%s911_s5 + $0x10] sm:$0xff]  }
  0x11   : > { %714 = vmatprep.mubr.msk.bf16.mxu0 %vm759_vm1, %v758_v1  ;;  %699 = vmatpush3.bf16.msra.mxu0 %v736_v24  ;;  %v739_v27 = vld [vmem:[%s911_s5 + $0x20] sm:$0xff]   ;;  %v742_v30 = vld [vmem:[%s911_s5 + $0x8] sm:$0xff]  }
  0x12   : > { %700 = vmatprep.subr.bf16.mxu0 %v758_v1  ;;  %v743_v31 = vld [vmem:[%s911_s5] sm:$0xff]  }
  0x13   : > { %681 = vmatpush3.bf16.msra.mxu1 %v729_v4  ;;  %v632_v32 = vld [vmem:[%s910_s4] ss:$0 sm:$0xff] }
  0x14   : > { %682 = vmatprep.subr.bf16.mxu1 %v758_v1  ;;  %v641_v44 = vld [vmem:[%s912_s6] ss:$0 sm:$0xff] }
  0x15   : > { %701 = vmatpush3.bf16.msra.mxu0 %v737_v25 }
  0x16   : > { %702 = vmatprep.subr.bf16.mxu0 %v758_v1 }
  0x17   : > { %683 = vmatpush3.bf16.msra.mxu1 %v730_v6 }
  0x18   : > { %684 = vmatprep.subr.bf16.mxu1 %v758_v1 }
  0x19   : > { %703 = vmatpush3.bf16.msra.mxu0 %v738_v26 }
  0x1a   : > { %704 = vmatprep.subr.bf16.mxu0 %v758_v1 }
  0x1b   : > { %685 = vmatpush3.bf16.msra.mxu1 %v731_v7 }
  0x1c   : > { %686 = vmatprep.subr.bf16.mxu1 %v758_v1 }
  0x1d   : > { %705 = vmatpush3.bf16.msra.mxu0 %v739_v27 }
  0x1e   : > { %706 = vmatprep.subr.bf16.mxu0 %v758_v1 }
  0x1f   : > { %687 = vmatpush3.bf16.msra.mxu1 %v732_v8 }
  0x20   : > { %688 = vmatprep.subr.bf16.mxu1 %v758_v1 }
  0x21   : > { %707 = vmatpush3.bf16.msra.mxu0 %v740_v28 }
  0x22   : > { %708 = vmatprep.subr.bf16.mxu0 %v758_v1 }
  0x23   : > { %689 = vmatpush3.bf16.msra.mxu1 %v733_v9 }
  0x24   : > { %690 = vmatprep.subr.bf16.mxu1 %v758_v1 }
  0x25   : > { %709 = vmatpush3.bf16.msra.mxu0 %v741_v29 }
  0x26   : > { %710 = vmatprep.subr.bf16.mxu0 %v758_v1 }
  0x27   : > { %691 = vmatpush3.bf16.msra.mxu1 %v734_v10 }
  0x28   : > { %692 = vmatprep.subr.bf16.mxu1 %v758_v1 }
  0x29   : > { %711 = vmatpush3.bf16.msra.mxu0 %v742_v30 }
  0x2a   : > { %712 = vmatprep.subr.bf16.mxu0 %v758_v1 }
  0x2b   : > { %693 = vmatpush3.bf16.msra.mxu1 %v735_v11 }
  0x2d   : > { %713 = vmatpush3.bf16.msra.mxu0 %v743_v31 }
  0xd0   : > { %v326_v13 = vpop.f32.mrf.mxu0 }
  0xd1   : > { %v327_v14 = vadd.f32 %v629_v12, %v326_v13 }
  0xd2   : > { %v676_v15 = vpop.f32.mrf.mxu0 }
  0xd3   : > { %v332_v16 = vmin.f32 %v327_v14, 0.0  ;;  %vm336_vm3 = vcmp.gt.f32.partialorder %v327_v14, 0.0 }
  0xd4   : > { %v329_v17 = vpop.f32.mrf.mxu0 }
  0xd5   : > { %v333_v18 = vmul.f32 1.442695, %v332_v16 }
  0xd6   : > { %v677_v19 = vpop.f32.mrf.mxu0 }
  0xd7   : > { %744 = vpow2.f32 %v333_v18 }
  0xe4   : > { %v745_v20 = vpop.eup %744 }
  0xe5   : > { %v631_v21 = vadd.f32 -1.0, %v745_v20 }
  0xe7   : > { %v337_v22 = vsel %vm336_vm3, %v327_v14, %v631_v21 }
  0xe8   : > { %v338_v23 = vpack.c.bf16 %v337_v22, %v337_v22 }
  0xea   : > { %695 = vmatmul.mubr.bf16.vlgmr.msra.gmra.mxu1 %v338_v23 }
 0x1aa   : > { %v444_v33 = vpop.f32.mrf.mxu1 }
 0x1ab   : > { %v445_v34 = vadd.f32 %v632_v32, %v444_v33 }
 0x1ac   : > { %v696_v35 = vpop.f32.mrf.mxu1 }
 0x1ad   : > { %v450_v36 = vsub.f32 0.0, %v445_v34 }
 0x1ae   : > { %v447_v37 = vpop.f32.mrf.mxu1 }
 0x1af   : > { %v451_v38 = vmul.f32 1.442695, %v450_v36 }
 0x1b0   : > { %v697_v39 = vpop.f32.mrf.mxu1 }
 0x1b1   : > { %746 = vpow2.f32 %v451_v38 }
 0x1be   : > { %v747_v40 = vpop.eup %746 }
 0x1bf   : > { %v453_v41 = vadd.f32 1.0, %v747_v40 }
 0x1c1   : > { %748 = vrcp.f32 %v453_v41 }
 0x1ce   : > { %v749_v42 = vpop.eup %748 }
 0x1cf   : > { %v456_v43 = vpack.c.bf16 %v749_v42, %v749_v42 }
 0x1d1   : > { %715 = vmatmul.mubr.bf16.vlgmr.msra.gmra.mxu0 %v456_v43 }
 0x291   : > { %v562_v45 = vpop.f32.mrf.mxu0 }
 0x292   : > { %v563_v46 = vadd.f32 %v641_v44, %v562_v45 }
 0x293   : > { %v716_v47 = vpop.f32.mrf.mxu0 }
 0x294   : > { %568 = vst.msk [vmem:[%s273_s8] sm:$0xff] %vm284_vm2, %v563_v46 }
 0x295   : > { %v565_v48 = vpop.f32.mrf.mxu0 }
 0x297   : > { %v717_v49 = vpop.f32.mrf.mxu0 }
 0x298 PF: > { %s17_s24 = sadd.s32 1, %s756_s24  }
 0x299   : > { %p14_p4 = scmp.ge.s32.totalorder %s17_s24, 4  }
 0x29b   :  { %16 = sbr.rel (!%p14_p4) target bundleno = 1 (0x1), region = 78 }

</bundles_post_ra>
